<compile_context>
chip_gen: v6e
topology: v6e:2x2x1
jax: 0.10.0
libtpu: 0.0.40
codegen_flags: <defaults>
</compile_context>

<pallas_src>
import math
from functools import partial

import jax
import jax.numpy as jnp
from jax.experimental import pallas as pl
from jax.experimental.pallas import tpu as pltpu


def _round_up(x, m):
    return ((x + m - 1) // m) * m


# ----------------------------- Pallas kernels -----------------------------

def _matmul_kernel(x_ref, w_ref, b_ref, o_ref, acc_ref, *, activation, nk):
    k = pl.program_id(2)

    @pl.when(k == 0)
    def _():
        acc_ref[...] = jnp.zeros_like(acc_ref)

    acc_ref[...] += jnp.dot(x_ref[...], w_ref[...],
                            preferred_element_type=jnp.float32)

    @pl.when(k == nk - 1)
    def _():
        y = acc_ref[...] + b_ref[...]
        if activation == "relu":
            y = jnp.maximum(y, 0.0)
        o_ref[...] = y.astype(o_ref.dtype)


def linear(x, w, b, activation="none"):
    """x: (M, K) f32 @ w: (K, N) f32 + b: (N,) -> (M, N) f32.

    bf16 MXU inputs, f32 accumulation, fused bias (+ReLU). Inputs are padded so
    the matmul tiles are (8,128)-aligned; padding is sliced off on return.
    """
    M, K = x.shape
    N = w.shape[1]
    # Conservative tiles: fit comfortably in v7x's smaller VMEM while still
    # feeding the MXU >=128-wide contractions once dims are realistic.
    tm = min(256, _round_up(M, 8))
    tk = min(256, _round_up(K, 128))
    tn = min(256, _round_up(N, 128))
    Mp, Kp, Np = _round_up(M, tm), _round_up(K, tk), _round_up(N, tn)

    xp = jnp.pad(x, ((0, Mp - M), (0, Kp - K))).astype(jnp.bfloat16)
    wp = jnp.pad(w, ((0, Kp - K), (0, Np - N))).astype(jnp.bfloat16)
    bp = jnp.pad(b, (0, Np - N)).astype(jnp.float32).reshape(1, Np)
    nk = Kp // tk

    out = pl.pallas_call(
        partial(_matmul_kernel, activation=activation, nk=nk),
        out_shape=jax.ShapeDtypeStruct((Mp, Np), jnp.float32),
        grid=(Mp // tm, Np // tn, nk),
        in_specs=[pl.BlockSpec((tm, tk), lambda i, j, k: (i, k)),
                  pl.BlockSpec((tk, tn), lambda i, j, k: (k, j)),
                  pl.BlockSpec((1, tn), lambda i, j, k: (0, j))],
        out_specs=pl.BlockSpec((tm, tn), lambda i, j, k: (i, j)),
        scratch_shapes=[pltpu.VMEM((tm, tn), jnp.float32)],
        compiler_params=pltpu.CompilerParams(
            dimension_semantics=("parallel", "parallel", "arbitrary")),
    )(xp, wp, bp)
    return out[:M, :N]


def _add_ln_kernel(x_ref, r_ref, g_ref, b_ref, o_ref, *, eps):
    x = x_ref[...] + r_ref[...]                       # fused residual add
    mu = jnp.mean(x, axis=-1, keepdims=True)
    var = jnp.mean((x - mu) ** 2, axis=-1, keepdims=True)
    o_ref[...] = (x - mu) * jax.lax.rsqrt(var + eps) * g_ref[...] + b_ref[...]


def add_layer_norm(x, r, g, b, eps=1e-5):
    """LayerNorm(x + r). x, r: (M, D) f32, g/b: (D,). PyTorch-style biased var."""
    M, D = x.shape
    tm = min(512, _round_up(M, 8))
    Mp = _round_up(M, tm)
    xp = jnp.pad(x, ((0, Mp - M), (0, 0)))
    rp = jnp.pad(r, ((0, Mp - M), (0, 0)))
    out = pl.pallas_call(
        partial(_add_ln_kernel, eps=eps),
        out_shape=jax.ShapeDtypeStruct((Mp, D), jnp.float32),
        grid=(Mp // tm,),
        in_specs=[pl.BlockSpec((tm, D), lambda i: (i, 0)),
                  pl.BlockSpec((tm, D), lambda i: (i, 0)),
                  pl.BlockSpec((1, D), lambda i: (0, 0)),
                  pl.BlockSpec((1, D), lambda i: (0, 0))],
        out_specs=pl.BlockSpec((tm, D), lambda i: (i, 0)),
        compiler_params=pltpu.CompilerParams(dimension_semantics=("parallel",)),
    )(xp, rp, g.reshape(1, D), b.reshape(1, D))
    return out[:M]


def _attention_kernel(q_ref, k_ref, v_ref, m_ref, o_ref, *, scale):
    # All heads of one batch element per grid step: lane-dense, single mask read.
    q = q_ref[0]          # (H, Sq, Dh) bf16
    k = k_ref[0]          # (H, Sk, Dh) bf16
    v = v_ref[0]          # (H, Sk, Dh) bf16
    m = m_ref[0]          # (1, Sq, Sk) f32 (1.0 = keep, 0.0 = masked)
    s = jnp.einsum('hqd,hkd->hqk', q, k,
                   preferred_element_type=jnp.float32) * scale
    mask = jnp.broadcast_to(m > 0, s.shape)
    s = jnp.where(mask, s, -1e30)
    s = s - jnp.max(s, axis=-1, keepdims=True)
    p = jnp.exp(s)
    p = p * pl.reciprocal(jnp.sum(p, axis=-1, keepdims=True), approx=True)
    o = jnp.einsum('hqk,hkd->hqd', p.astype(v.dtype), v,
                   preferred_element_type=jnp.float32)
    o_ref[0] = o.astype(o_ref.dtype)


def scaled_dot_attention(q, k, v, mask):
    """q: (B,H,Sq,Dh) bf16, k/v: (B,H,Sk,Dh) bf16, mask: (B,1,Sq,Sk) f32 -> (B,H,Sq,Dh) f32."""
    # TODO(synk): for long sequences convert to a flash-style online-softmax kernel
    # (Sq/Sk tiling + m/l/acc VMEM scratch) instead of the full (Sq,Sk) score block.
    B, H, Sq, Dh = q.shape
    Sk = k.shape[2]
    scale = 1.0 / math.sqrt(Dh)
    return pl.pallas_call(
        partial(_attention_kernel, scale=scale),
        out_shape=jax.ShapeDtypeStruct((B, H, Sq, Dh), jnp.float32),
        grid=(B,),
        in_specs=[pl.BlockSpec((1, H, Sq, Dh), lambda b: (b, 0, 0, 0)),
                  pl.BlockSpec((1, H, Sk, Dh), lambda b: (b, 0, 0, 0)),
                  pl.BlockSpec((1, H, Sk, Dh), lambda b: (b, 0, 0, 0)),
                  pl.BlockSpec((1, 1, Sq, Sk), lambda b: (b, 0, 0, 0))],
        out_specs=pl.BlockSpec((1, H, Sq, Dh), lambda b: (b, 0, 0, 0)),
        compiler_params=pltpu.CompilerParams(dimension_semantics=("parallel",)),
    )(q, k, v, mask)


def _log_softmax_seq_kernel(x_ref, o_ref):
    x = x_ref[0]                                    # (S, V)
    m = jnp.max(x, axis=0, keepdims=True)           # reduce over sequence (sublane)
    s = x - m
    o_ref[0] = s - jnp.log(jnp.sum(jnp.exp(s), axis=0, keepdims=True))


def log_softmax_over_seq(x):
    """log_softmax over dim=1 of (B, S, V) without transposing V off the lane axis."""
    B, S, V = x.shape
    return pl.pallas_call(
        _log_softmax_seq_kernel,
        out_shape=jax.ShapeDtypeStruct((B, S, V), jnp.float32),
        grid=(B,),
        in_specs=[pl.BlockSpec((1, S, V), lambda b: (b, 0, 0))],
        out_specs=pl.BlockSpec((1, S, V), lambda b: (b, 0, 0)),
        compiler_params=pltpu.CompilerParams(dimension_semantics=("parallel",)),
    )(x)


# --------------------------- model glue (plain JAX) ---------------------------

def sinusoidal_pos_encoding(max_len, d_model):
    pos = jnp.arange(max_len, dtype=jnp.float32)[:, None]
    div = jnp.exp(jnp.arange(0, d_model, 2, dtype=jnp.float32)
                  * (-math.log(10000.0) / d_model))
    pe = jnp.zeros((max_len, d_model), jnp.float32)
    pe = pe.at[:, 0::2].set(jnp.sin(pos * div))
    pe = pe.at[:, 1::2].set(jnp.cos(pos * div))
    return pe


def embed(tokens, emb_table, pos_enc, d_model):
    # TODO(synk): embedding gather has no clean BlockSpec form at this size; stays in XLA glue.
    x = emb_table[tokens] * math.sqrt(d_model)
    return x + pos_enc[: tokens.shape[1]][None, :, :]


def make_pad_mask(query, key, pad_idx=1):
    key_mask = (key != pad_idx)[:, None, None, :]      # (B,1,1,Sk)
    query_mask = (query != pad_idx)[:, None, :, None]  # (B,1,Sq,1)
    return key_mask & query_mask                       # (B,1,Sq,Sk) bool


def make_subsequent_mask(sq, sk):
    # TODO(synk): reference make_subsequent_mask has bugs (torch.book, missing self);
    # this implements its evident intent (lower-triangular causal mask).
    return jnp.tril(jnp.ones((sq, sk), dtype=bool))


def multi_head_attention(p, q_in, kv_in, mask, n_heads):
    """mask: (B, 1, Sq, Sk) float32 (shared across heads, no per-head duplication)."""
    B, Sq, D = q_in.shape
    Sk = kv_in.shape[1]
    Dh = D // n_heads
    if q_in is kv_in:
        # fused QKV projection: one matmul over the concatenated (D, 3D) weight
        qkv = linear(q_in.reshape(B * Sq, D), p["wqkv"], p["bqkv"])
        q, k, v = qkv[:, :D], qkv[:, D:2 * D], qkv[:, 2 * D:]
    else:
        # cross-attention: fused KV projection on the encoder memory
        q = linear(q_in.reshape(B * Sq, D), p["wqkv"][:, :D], p["bqkv"][:D])
        kv = linear(kv_in.reshape(B * Sk, D), p["wqkv"][:, D:], p["bqkv"][D:])
        k, v = kv[:, :D], kv[:, D:]
    q = q.reshape(B, Sq, n_heads, Dh).transpose(0, 2, 1, 3).astype(jnp.bfloat16)
    k = k.reshape(B, Sk, n_heads, Dh).transpose(0, 2, 1, 3).astype(jnp.bfloat16)
    v = v.reshape(B, Sk, n_heads, Dh).transpose(0, 2, 1, 3).astype(jnp.bfloat16)
    o = scaled_dot_attention(q, k, v, mask)                       # (B,H,Sq,Dh) f32
    o = o.transpose(0, 2, 1, 3).reshape(B * Sq, D)
    return linear(o, p["wo"], p["bo"]).reshape(B, Sq, D)


def encoder_layer(p, x, mask, n_heads):
    B, S, D = x.shape
    a = multi_head_attention(p["attn"], x, x, mask, n_heads)
    x2 = add_layer_norm(x.reshape(B * S, D), a.reshape(B * S, D),
                        p["ln1_g"], p["ln1_b"])
    h = linear(x2, p["ff_w1"], p["ff_b1"], activation="relu")
    h = linear(h, p["ff_w2"], p["ff_b2"])
    x3 = add_layer_norm(x2, h, p["ln2_g"], p["ln2_b"])
    return x3.reshape(B, S, D)


def decoder_layer(p, y, c, tgt_mask, cross_mask, n_heads):
    B, S, D = y.shape
    a = multi_head_attention(p["self_attn"], y, y, tgt_mask, n_heads)
    y2 = add_layer_norm(y.reshape(B * S, D), a.reshape(B * S, D),
                        p["ln1_g"], p["ln1_b"])
    a = multi_head_attention(p["cross_attn"], y2.reshape(B, S, D), c,
                             cross_mask, n_heads)
    y3 = add_layer_norm(y2, a.reshape(B * S, D), p["ln2_g"], p["ln2_b"])
    h = linear(y3, p["ff_w1"], p["ff_b1"], activation="relu")
    h = linear(h, p["ff_w2"], p["ff_b2"])
    y4 = add_layer_norm(y3, h, p["ln3_g"], p["ln3_b"])
    return y4.reshape(B, S, D)


def transformer_forward(params, x, z, d_model, n_heads, pad_idx=1):
    # --- masks (exactly as in the reference forward) ---
    S = x.shape[1]
    src_mask = make_pad_mask(x, x, pad_idx)
    tgt_mask = src_mask & make_subsequent_mask(S, S)[None, None, :, :]
    _src_tgt_mask = make_pad_mask(z, x, pad_idx)   # computed but (as in reference) unused
    src_mask_f = src_mask.astype(jnp.float32)      # (B,1,S,S): one slab shared by all heads
    tgt_mask_f = tgt_mask.astype(jnp.float32)

    # --- encode ---
    c = embed(x, params["src_emb"], params["pos"], d_model)
    for lp in params["enc_layers"]:
        c = encoder_layer(lp, c, src_mask_f, n_heads)

    # --- decode (reference passes src_mask as the cross-attention mask) ---
    y = embed(z, params["tgt_emb"], params["pos"], d_model)
    for lp in params["dec_layers"]:
        y = decoder_layer(lp, y, c, tgt_mask_f, src_mask_f, n_heads)

    # --- generator + log_softmax over dim=1 (sequence axis), as in reference ---
    B, S, D = y.shape
    logits = linear(y.reshape(B * S, D), params["gen_w"], params["gen_b"])
    logits = logits.reshape(B, S, -1)
    out = log_softmax_over_seq(logits)             # softmax along S, V stays on lanes
    return out, y


# ------------------------------- init helpers -------------------------------

def _dense(key, fan_in, fan_out):
    w = jax.random.normal(key, (fan_in, fan_out), jnp.float32) * 0.02
    b = jnp.zeros((fan_out,), jnp.float32)
    return w, b


def _attn_params(key, d_model):
    ks = jax.random.split(key, 4)
    wq, bq = _dense(ks[0], d_model, d_model)
    wk, bk = _dense(ks[1], d_model, d_model)
    wv, bv = _dense(ks[2], d_model, d_model)
    wo, bo = _dense(ks[3], d_model, d_model)
    return {"wqkv": jnp.concatenate([wq, wk, wv], axis=1),
            "bqkv": jnp.concatenate([bq, bk, bv]),
            "wo": wo, "bo": bo}


def _enc_layer_params(key, d_model, d_ff):
    ks = jax.random.split(key, 3)
    p = {"attn": _attn_params(ks[0], d_model)}
    p["ff_w1"], p["ff_b1"] = _dense(ks[1], d_model, d_ff)
    p["ff_w2"], p["ff_b2"] = _dense(ks[2], d_ff, d_model)
    p["ln1_g"] = jnp.ones((d_model,), jnp.float32); p["ln1_b"] = jnp.zeros((d_model,), jnp.float32)
    p["ln2_g"] = jnp.ones((d_model,), jnp.float32); p["ln2_b"] = jnp.zeros((d_model,), jnp.float32)
    return p


def _dec_layer_params(key, d_model, d_ff):
    ks = jax.random.split(key, 4)
    p = {"self_attn": _attn_params(ks[0], d_model),
         "cross_attn": _attn_params(ks[1], d_model)}
    p["ff_w1"], p["ff_b1"] = _dense(ks[2], d_model, d_ff)
    p["ff_w2"], p["ff_b2"] = _dense(ks[3], d_ff, d_model)
    for i in (1, 2, 3):
        p[f"ln{i}_g"] = jnp.ones((d_model,), jnp.float32)
        p[f"ln{i}_b"] = jnp.zeros((d_model,), jnp.float32)
    return p


def init_params(key, vocab, d_model, d_ff, n_enc, n_dec, max_len):
    ks = jax.random.split(key, 3 + n_enc + n_dec)
    params = {
        "src_emb": jax.random.normal(ks[0], (vocab, d_model), jnp.float32) * 0.02,
        "tgt_emb": jax.random.normal(ks[1], (vocab, d_model), jnp.float32) * 0.02,
        "pos": sinusoidal_pos_encoding(max_len, d_model),
        "enc_layers": [_enc_layer_params(ks[3 + i], d_model, d_ff) for i in range(n_enc)],
        "dec_layers": [_dec_layer_params(ks[3 + n_enc + i], d_model, d_ff) for i in range(n_dec)],
    }
    params["gen_w"], params["gen_b"] = _dense(ks[2], d_model, vocab)
    return params


# ----------------------------------- main -----------------------------------

if __name__ == "__main__":
    B, S = 2, 8                 # src and tgt seq lengths must match (reference passes
    d_model, n_heads = 32, 4    # src_mask / x-derived tgt_mask to the decoder)
    d_ff, vocab = 64, 16
    n_enc = n_dec = 2

    key = jax.random.PRNGKey(0)
    kx, kz, kp = jax.random.split(key, 3)
    x = jax.random.randint(kx, (B, S), 0, vocab, dtype=jnp.int32)   # src token ids
    z = jax.random.randint(kz, (B, S), 0, vocab, dtype=jnp.int32)   # tgt token ids

    params = init_params(kp, vocab, d_model, d_ff, n_enc, n_dec, max_len=S)

    fwd = jax.jit(partial(transformer_forward, d_model=d_model, n_heads=n_heads))
    out, y = fwd(params, x, z)
    jax.block_until_ready((out, y))

    assert out.shape == (B, S, vocab) and y.shape == (B, S, d_model)
    assert bool(jnp.all(jnp.isfinite(out))) and bool(jnp.all(jnp.isfinite(y)))
    print("KERNEL_OK")
</pallas_src>

<mosaic_0001>
module attributes {stable_mosaic.version = 11 : i64} {
  func.func @_matmul_kernel(%arg0: i32, %arg1: i32, %arg2: i32, %arg3: memref<16x128xbf16, #tpu.memory_space<vmem>>, %arg4: memref<128x128xbf16, #tpu.memory_space<vmem>>, %arg5: memref<1x128xf32, #tpu.memory_space<vmem>>, %arg6: memref<16x128xf32, #tpu.memory_space<vmem>>, %arg7: memref<16x128xf32, #tpu.memory_space<vmem>>) attributes {dimension_semantics = [#tpu.dimension_semantics<parallel>, #tpu.dimension_semantics<parallel>, #tpu.dimension_semantics<arbitrary>], iteration_bounds = array<i64: 1, 1, 1>, scalar_prefetch = 0 : i64, scratch_operands = 1 : i64, tpu.core_type = #tpu.core_type<tc>, window_params = [{transform_indices = @transform_0, window_bounds = array<i64: 16, 128>}, {transform_indices = @transform_1, window_bounds = array<i64: 128, 128>}, {transform_indices = @transform_2, window_bounds = array<i64: 1, 128>}, {transform_indices = @transform_3, window_bounds = array<i64: 16, 128>}]} {
    %c0_i32 = arith.constant 0 : i32
    %0 = arith.cmpi eq, %arg2, %c0_i32 : i32
    %1 = arith.extui %0 : i1 to i32
    %c0_i32_0 = arith.constant 0 : i32
    %2 = arith.cmpi ne, %1, %c0_i32_0 : i32
    scf.if %2 {
      %cst_10 = arith.constant 0.000000e+00 : f32
      %12 = vector.broadcast %cst_10 : f32 to vector<16x128xf32>
      %c0_11 = arith.constant 0 : index
      %c0_12 = arith.constant 0 : index
      %13 = vector.load %arg7[%c0_11, %c0_12] : memref<16x128xf32, #tpu.memory_space<vmem>>, vector<16x128xf32>
      tpu.vector_store %arg7[%c0_11, %c0_12], %12 {strides = array<i32>} : memref<16x128xf32, #tpu.memory_space<vmem>>, vector<16x128xf32>,
    } else {
    }
    %c0 = arith.constant 0 : index
    %c0_1 = arith.constant 0 : index
    %3 = vector.load %arg7[%c0, %c0_1] : memref<16x128xf32, #tpu.memory_space<vmem>>, vector<16x128xf32>
    %c0_2 = arith.constant 0 : index
    %c0_3 = arith.constant 0 : index
    %4 = vector.load %arg3[%c0_2, %c0_3] : memref<16x128xbf16, #tpu.memory_space<vmem>>, vector<16x128xbf16>
    %c0_4 = arith.constant 0 : index
    %c0_5 = arith.constant 0 : index
    %5 = vector.load %arg4[%c0_4, %c0_5] : memref<128x128xbf16, #tpu.memory_space<vmem>>, vector<128x128xbf16>
    %cst = arith.constant dense<0.000000e+00> : vector<16x128xf32>
    %6 = tpu.matmul %4, %5, %cst {dimension_numbers = #tpu.dot_dimension_numbers<[1], [0], [0], [1], [0, 0, 1, 1], [], []>} : vector<16x128xbf16>, vector<128x128xbf16>, vector<16x128xf32> -> vector<16x128xf32>
    %7 = arith.addf %3, %6 : vector<16x128xf32>
    %c0_6 = arith.constant 0 : index
    %c0_7 = arith.constant 0 : index
    %8 = vector.load %arg7[%c0_6, %c0_7] : memref<16x128xf32, #tpu.memory_space<vmem>>, vector<16x128xf32>
    tpu.vector_store %arg7[%c0_6, %c0_7], %7 {strides = array<i32>} : memref<16x128xf32, #tpu.memory_space<vmem>>, vector<16x128xf32>,
    %c0_i32_8 = arith.constant 0 : i32
    %9 = arith.cmpi eq, %arg2, %c0_i32_8 : i32
    %10 = arith.extui %9 : i1 to i32
    %c0_i32_9 = arith.constant 0 : i32
    %11 = arith.cmpi ne, %10, %c0_i32_9 : i32
    scf.if %11 {
      %c0_10 = arith.constant 0 : index
      %c0_11 = arith.constant 0 : index
      %12 = vector.load %arg7[%c0_10, %c0_11] : memref<16x128xf32, #tpu.memory_space<vmem>>, vector<16x128xf32>
      %c0_12 = arith.constant 0 : index
      %c0_13 = arith.constant 0 : index
      %13 = vector.load %arg5[%c0_12, %c0_13] : memref<1x128xf32, #tpu.memory_space<vmem>>, vector<1x128xf32>
      %14 = vector.broadcast %13 : vector<1x128xf32> to vector<16x128xf32>
      %15 = arith.addf %12, %14 : vector<16x128xf32>
      %c0_14 = arith.constant 0 : index
      %c0_15 = arith.constant 0 : index
      %16 = vector.load %arg6[%c0_14, %c0_15] : memref<16x128xf32, #tpu.memory_space<vmem>>, vector<16x128xf32>
      tpu.vector_store %arg6[%c0_14, %c0_15], %15 {strides = array<i32>} : memref<16x128xf32, #tpu.memory_space<vmem>>, vector<16x128xf32>,
    } else {
    }
    return
  }
  func.func @transform_0(%arg0: i32, %arg1: i32, %arg2: i32) -> (i32, i32) {
    %c0_i32 = arith.constant 0 : i32
    return %arg0, %arg2 : i32, i32
  }
  func.func @transform_1(%arg0: i32, %arg1: i32, %arg2: i32) -> (i32, i32) {
    %c0_i32 = arith.constant 0 : i32
    return %arg2, %arg1 : i32, i32
  }
  func.func @transform_2(%arg0: i32, %arg1: i32, %arg2: i32) -> (i32, i32) {
    %c0_i32 = arith.constant 0 : i32
    %c0_i32_0 = arith.constant 0 : i32
    return %c0_i32, %arg1 : i32, i32
  }
  func.func @transform_3(%arg0: i32, %arg1: i32, %arg2: i32) -> (i32, i32) {
    %c0_i32 = arith.constant 0 : i32
    return %arg0, %arg1 : i32, i32
  }
}

module attributes {stable_mosaic.version = 11 : i64} {
  func.func @_attention_kernel(%arg0: i32, %arg1: memref<1x4x8x8xbf16, #tpu.memory_space<vmem>>, %arg2: memref<1x4x8x8xbf16, #tpu.memory_space<vmem>>, %arg3: memref<1x4x8x8xbf16, #tpu.memory_space<vmem>>, %arg4: memref<1x1x8x8xf32, #tpu.memory_space<vmem>>, %arg5: memref<1x4x8x8xf32, #tpu.memory_space<vmem>>) attributes {dimension_semantics = [#tpu.dimension_semantics<parallel>], iteration_bounds = array<i64: 2>, scalar_prefetch = 0 : i64, scratch_operands = 0 : i64, tpu.core_type = #tpu.core_type<tc>, window_params = [{transform_indices = @transform_0, window_bounds = array<i64: 1, 4, 8, 8>}, {transform_indices = @transform_1, window_bounds = array<i64: 1, 4, 8, 8>}, {transform_indices = @transform_2, window_bounds = array<i64: 1, 4, 8, 8>}, {transform_indices = @transform_3, window_bounds = array<i64: 1, 1, 8, 8>}, {transform_indices = @transform_4, window_bounds = array<i64: 1, 4, 8, 8>}]} {
    %c0 = arith.constant 0 : index
    %c0_0 = arith.constant 0 : index
    %c0_1 = arith.constant 0 : index
    %c0_2 = arith.constant 0 : index
    %0 = vector.load %arg1[%c0, %c0_0, %c0_1, %c0_2] : memref<1x4x8x8xbf16, #tpu.memory_space<vmem>>, vector<1x4x8x8xbf16>
    %1 = vector.shape_cast %0 : vector<1x4x8x8xbf16> to vector<4x8x8xbf16>
    %c0_3 = arith.constant 0 : index
    %c0_4 = arith.constant 0 : index
    %c0_5 = arith.constant 0 : index
    %c0_6 = arith.constant 0 : index
    %2 = vector.load %arg2[%c0_3, %c0_4, %c0_5, %c0_6] : memref<1x4x8x8xbf16, #tpu.memory_space<vmem>>, vector<1x4x8x8xbf16>
    %3 = vector.shape_cast %2 : vector<1x4x8x8xbf16> to vector<4x8x8xbf16>
    %c0_7 = arith.constant 0 : index
    %c0_8 = arith.constant 0 : index
    %c0_9 = arith.constant 0 : index
    %c0_10 = arith.constant 0 : index
    %4 = vector.load %arg3[%c0_7, %c0_8, %c0_9, %c0_10] : memref<1x4x8x8xbf16, #tpu.memory_space<vmem>>, vector<1x4x8x8xbf16>
    %5 = vector.shape_cast %4 : vector<1x4x8x8xbf16> to vector<4x8x8xbf16>
    %c0_11 = arith.constant 0 : index
    %c0_12 = arith.constant 0 : index
    %c0_13 = arith.constant 0 : index
    %c0_14 = arith.constant 0 : index
    %6 = vector.load %arg4[%c0_11, %c0_12, %c0_13, %c0_14] : memref<1x1x8x8xf32, #tpu.memory_space<vmem>>, vector<1x1x8x8xf32>
    %7 = vector.shape_cast %6 : vector<1x1x8x8xf32> to vector<1x8x8xf32>
    "tpu.trace_start"() <{level = 10 : i32, message = "hqd,hkd->hqk"}> : () -> ()
    %cst = arith.constant dense<0.000000e+00> : vector<4x8x8xf32>
    %8 = tpu.matmul %1, %3, %cst {dimension_numbers = #tpu.dot_dimension_numbers<[2], [2], [1], [1], [0, 0, 0, 1, 1, 1], [0], [0]>} : vector<4x8x8xbf16>, vector<4x8x8xbf16>, vector<4x8x8xf32> -> vector<4x8x8xf32>
    "tpu.trace_stop"() : () -> ()
    %cst_15 = arith.constant 0.353553385 : f32
    %9 = vector.broadcast %cst_15 : f32 to vector<4x8x8xf32>
    %10 = arith.mulf %8, %9 : vector<4x8x8xf32>
    %cst_16 = arith.constant 0.000000e+00 : f32
    %11 = vector.broadcast %cst_16 : f32 to vector<1x8x8xf32>
    %12 = arith.cmpf ogt, %7, %11 : vector<1x8x8xf32>
    %13 = vector.shape_cast %12 : vector<1x8x8xi1> to vector<1x8x8xi1>
    %14 = vector.broadcast %13 : vector<1x8x8xi1> to vector<4x8x8xi1>
    %cst_17 = arith.constant -1.000000e+30 : f32
    %15 = vector.broadcast %cst_17 : f32 to vector<4x8x8xf32>
    %16 = arith.select %14, %10, %15 : vector<4x8x8xi1>, vector<4x8x8xf32>
    %cst_18 = arith.constant dense<0xFF800000> : vector<4x8xf32>
    %17 = vector.multi_reduction <maximumf>, %16, %cst_18 [2] : vector<4x8x8xf32> to vector<4x8xf32>
    %18 = vector.shape_cast %17 : vector<4x8xf32> to vector<4x8x1xf32>
    %19 = vector.broadcast %18 : vector<4x8x1xf32> to vector<4x8x8xf32>
    %20 = arith.subf %16, %19 : vector<4x8x8xf32>
    %21 = math.exp %20 : vector<4x8x8xf32>
    %cst_19 = arith.constant dense<0.000000e+00> : vector<4x8xf32>
    %22 = vector.multi_reduction <add>, %21, %cst_19 [2] : vector<4x8x8xf32> to vector<4x8xf32>
    %23 = vector.shape_cast %22 : vector<4x8xf32> to vector<4x8x1xf32>
    %24 = tpu.reciprocal %23 {approx = true} : vector<4x8x1xf32> -> vector<4x8x1xf32>
    %25 = vector.broadcast %24 : vector<4x8x1xf32> to vector<4x8x8xf32>
    %26 = arith.mulf %21, %25 : vector<4x8x8xf32>
    %27 = arith.truncf %26 : vector<4x8x8xf32> to vector<4x8x8xbf16>
    "tpu.trace_start"() <{level = 10 : i32, message = "hqk,hkd->hqd"}> : () -> ()
    %cst_20 = arith.constant dense<0.000000e+00> : vector<4x8x8xf32>
    %28 = tpu.matmul %27, %5, %cst_20 {dimension_numbers = #tpu.dot_dimension_numbers<[2], [1], [1], [2], [0, 0, 0, 1, 1, 2], [0], [0]>} : vector<4x8x8xbf16>, vector<4x8x8xbf16>, vector<4x8x8xf32> -> vector<4x8x8xf32>
    "tpu.trace_stop"() : () -> ()
    %c0_21 = arith.constant 0 : index
    %c0_22 = arith.constant 0 : index
    %c0_23 = arith.constant 0 : index
    %c0_24 = arith.constant 0 : index
    %29 = vector.load %arg5[%c0_21, %c0_22, %c0_23, %c0_24] : memref<1x4x8x8xf32, #tpu.memory_space<vmem>>, vector<1x4x8x8xf32>
    %30 = vector.shape_cast %29 : vector<1x4x8x8xf32> to vector<4x8x8xf32>
    %31 = vector.shape_cast %28 : vector<4x8x8xf32> to vector<1x4x8x8xf32>
    tpu.vector_store %arg5[%c0_21, %c0_22, %c0_23, %c0_24], %31 {strides = array<i32>} : memref<1x4x8x8xf32, #tpu.memory_space<vmem>>, vector<1x4x8x8xf32>,
    return
  }
  func.func @transform_0(%arg0: i32) -> (i32, i32, i32, i32) {
    %c0_i32 = arith.constant 0 : i32
    %c0_i32_0 = arith.constant 0 : i32
    %c0_i32_1 = arith.constant 0 : i32
    %c0_i32_2 = arith.constant 0 : i32
    return %arg0, %c0_i32, %c0_i32_0, %c0_i32_1 : i32, i32, i32, i32
  }
  func.func @transform_1(%arg0: i32) -> (i32, i32, i32, i32) {
    %c0_i32 = arith.constant 0 : i32
    %c0_i32_0 = arith.constant 0 : i32
    %c0_i32_1 = arith.constant 0 : i32
    %c0_i32_2 = arith.constant 0 : i32
    return %arg0, %c0_i32, %c0_i32_0, %c0_i32_1 : i32, i32, i32, i32
  }
  func.func @transform_2(%arg0: i32) -> (i32, i32, i32, i32) {
    %c0_i32 = arith.constant 0 : i32
    %c0_i32_0 = arith.constant 0 : i32
    %c0_i32_1 = arith.constant 0 : i32
    %c0_i32_2 = arith.constant 0 : i32
    return %arg0, %c0_i32, %c0_i32_0, %c0_i32_1 : i32, i32, i32, i32
  }
  func.func @transform_3(%arg0: i32) -> (i32, i32, i32, i32) {
    %c0_i32 = arith.constant 0 : i32
    %c0_i32_0 = arith.constant 0 : i32
    %c0_i32_1 = arith.constant 0 : i32
    %c0_i32_2 = arith.constant 0 : i32
    return %arg0, %c0_i32, %c0_i32_0, %c0_i32_1 : i32, i32, i32, i32
  }
  func.func @transform_4(%arg0: i32) -> (i32, i32, i32, i32) {
    %c0_i32 = arith.constant 0 : i32
    %c0_i32_0 = arith.constant 0 : i32
    %c0_i32_1 = arith.constant 0 : i32
    %c0_i32_2 = arith.constant 0 : i32
    return %arg0, %c0_i32, %c0_i32_0, %c0_i32_1 : i32, i32, i32, i32
  }
}

module attributes {stable_mosaic.version = 11 : i64} {
  func.func @_add_ln_kernel(%arg0: i32, %arg1: memref<16x32xf32, #tpu.memory_space<vmem>>, %arg2: memref<16x32xf32, #tpu.memory_space<vmem>>, %arg3: memref<1x32xf32, #tpu.memory_space<vmem>>, %arg4: memref<1x32xf32, #tpu.memory_space<vmem>>, %arg5: memref<16x32xf32, #tpu.memory_space<vmem>>) attributes {dimension_semantics = [#tpu.dimension_semantics<parallel>], iteration_bounds = array<i64: 1>, scalar_prefetch = 0 : i64, scratch_operands = 0 : i64, tpu.core_type = #tpu.core_type<tc>, window_params = [{transform_indices = @transform_0, window_bounds = array<i64: 16, 32>}, {transform_indices = @transform_1, window_bounds = array<i64: 16, 32>}, {pipeline_mode = #tpu.pipeline_mode<synchronous>, transform_indices = @transform_2, window_bounds = array<i64: 1, 32>}, {pipeline_mode = #tpu.pipeline_mode<synchronous>, transform_indices = @transform_3, window_bounds = array<i64: 1, 32>}, {transform_indices = @transform_4, window_bounds = array<i64: 16, 32>}]} {
    %c0 = arith.constant 0 : index
    %c0_0 = arith.constant 0 : index
    %0 = vector.load %arg1[%c0, %c0_0] : memref<16x32xf32, #tpu.memory_space<vmem>>, vector<16x32xf32>
    %c0_1 = arith.constant 0 : index
    %c0_2 = arith.constant 0 : index
    %1 = vector.load %arg2[%c0_1, %c0_2] : memref<16x32xf32, #tpu.memory_space<vmem>>, vector<16x32xf32>
    %2 = arith.addf %0, %1 : vector<16x32xf32>
    %cst = arith.constant dense<0.000000e+00> : vector<16xf32>
    %3 = vector.multi_reduction <add>, %2, %cst [1] : vector<16x32xf32> to vector<16xf32>
    %4 = vector.shape_cast %3 : vector<16xf32> to vector<16x1xf32>
    %cst_3 = arith.constant 3.200000e+01 : f32
    %5 = vector.broadcast %cst_3 : f32 to vector<16x1xf32>
    %6 = arith.divf %4, %5 : vector<16x1xf32>
    %7 = vector.broadcast %6 : vector<16x1xf32> to vector<16x32xf32>
    %8 = arith.subf %2, %7 : vector<16x32xf32>
    %9 = arith.mulf %8, %8 : vector<16x32xf32>
    %cst_4 = arith.constant dense<0.000000e+00> : vector<16xf32>
    %10 = vector.multi_reduction <add>, %9, %cst_4 [1] : vector<16x32xf32> to vector<16xf32>
    %11 = vector.shape_cast %10 : vector<16xf32> to vector<16x1xf32>
    %cst_5 = arith.constant 3.200000e+01 : f32
    %12 = vector.broadcast %cst_5 : f32 to vector<16x1xf32>
    %13 = arith.divf %11, %12 : vector<16x1xf32>
    %14 = vector.broadcast %6 : vector<16x1xf32> to vector<16x32xf32>
    %15 = arith.subf %2, %14 : vector<16x32xf32>
    %cst_6 = arith.constant 9.99999974E-6 : f32
    %16 = vector.broadcast %cst_6 : f32 to vector<16x1xf32>
    %17 = arith.addf %13, %16 : vector<16x1xf32>
    %18 = math.rsqrt %17 : vector<16x1xf32>
    %19 = vector.broadcast %18 : vector<16x1xf32> to vector<16x32xf32>
    %20 = arith.mulf %15, %19 : vector<16x32xf32>
    %c0_7 = arith.constant 0 : index
    %c0_8 = arith.constant 0 : index
    %21 = vector.load %arg3[%c0_7, %c0_8] : memref<1x32xf32, #tpu.memory_space<vmem>>, vector<1x32xf32>
    %22 = vector.broadcast %21 : vector<1x32xf32> to vector<16x32xf32>
    %23 = arith.mulf %20, %22 : vector<16x32xf32>
    %c0_9 = arith.constant 0 : index
    %c0_10 = arith.constant 0 : index
    %24 = vector.load %arg4[%c0_9, %c0_10] : memref<1x32xf32, #tpu.memory_space<vmem>>, vector<1x32xf32>
    %25 = vector.broadcast %24 : vector<1x32xf32> to vector<16x32xf32>
    %26 = arith.addf %23, %25 : vector<16x32xf32>
    %c0_11 = arith.constant 0 : index
    %c0_12 = arith.constant 0 : index
    %27 = vector.load %arg5[%c0_11, %c0_12] : memref<16x32xf32, #tpu.memory_space<vmem>>, vector<16x32xf32>
    tpu.vector_store %arg5[%c0_11, %c0_12], %26 {strides = array<i32>} : memref<16x32xf32, #tpu.memory_space<vmem>>, vector<16x32xf32>,
    return
  }
  func.func @transform_0(%arg0: i32) -> (i32, i32) {
    %c0_i32 = arith.constant 0 : i32
    %c0_i32_0 = arith.constant 0 : i32
    return %arg0, %c0_i32 : i32, i32
  }
  func.func @transform_1(%arg0: i32) -> (i32, i32) {
    %c0_i32 = arith.constant 0 : i32
    %c0_i32_0 = arith.constant 0 : i32
    return %arg0, %c0_i32 : i32, i32
  }
  func.func @transform_2(%arg0: i32) -> (i32, i32) {
    %c0_i32 = arith.constant 0 : i32
    %c0_i32_0 = arith.constant 0 : i32
    %c0_i32_1 = arith.constant 0 : i32
    return %c0_i32, %c0_i32_0 : i32, i32
  }
  func.func @transform_3(%arg0: i32) -> (i32, i32) {
    %c0_i32 = arith.constant 0 : i32
    %c0_i32_0 = arith.constant 0 : i32
    %c0_i32_1 = arith.constant 0 : i32
    return %c0_i32, %c0_i32_0 : i32, i32
  }
  func.func @transform_4(%arg0: i32) -> (i32, i32) {
    %c0_i32 = arith.constant 0 : i32
    %c0_i32_0 = arith.constant 0 : i32
    return %arg0, %c0_i32 : i32, i32
  }
}

module attributes {stable_mosaic.version = 11 : i64} {
  func.func @_matmul_kernel(%arg0: i32, %arg1: i32, %arg2: i32, %arg3: memref<16x128xbf16, #tpu.memory_space<vmem>>, %arg4: memref<128x128xbf16, #tpu.memory_space<vmem>>, %arg5: memref<1x128xf32, #tpu.memory_space<vmem>>, %arg6: memref<16x128xf32, #tpu.memory_space<vmem>>, %arg7: memref<16x128xf32, #tpu.memory_space<vmem>>) attributes {dimension_semantics = [#tpu.dimension_semantics<parallel>, #tpu.dimension_semantics<parallel>, #tpu.dimension_semantics<arbitrary>], iteration_bounds = array<i64: 1, 1, 1>, scalar_prefetch = 0 : i64, scratch_operands = 1 : i64, tpu.core_type = #tpu.core_type<tc>, window_params = [{transform_indices = @transform_0, window_bounds = array<i64: 16, 128>}, {transform_indices = @transform_1, window_bounds = array<i64: 128, 128>}, {transform_indices = @transform_2, window_bounds = array<i64: 1, 128>}, {transform_indices = @transform_3, window_bounds = array<i64: 16, 128>}]} {
    %c0_i32 = arith.constant 0 : i32
    %0 = arith.cmpi eq, %arg2, %c0_i32 : i32
    %1 = arith.extui %0 : i1 to i32
    %c0_i32_0 = arith.constant 0 : i32
    %2 = arith.cmpi ne, %1, %c0_i32_0 : i32
    scf.if %2 {
      %cst_10 = arith.constant 0.000000e+00 : f32
      %12 = vector.broadcast %cst_10 : f32 to vector<16x128xf32>
      %c0_11 = arith.constant 0 : index
      %c0_12 = arith.constant 0 : index
      %13 = vector.load %arg7[%c0_11, %c0_12] : memref<16x128xf32, #tpu.memory_space<vmem>>, vector<16x128xf32>
      tpu.vector_store %arg7[%c0_11, %c0_12], %12 {strides = array<i32>} : memref<16x128xf32, #tpu.memory_space<vmem>>, vector<16x128xf32>,
    } else {
    }
    %c0 = arith.constant 0 : index
    %c0_1 = arith.constant 0 : index
    %3 = vector.load %arg7[%c0, %c0_1] : memref<16x128xf32, #tpu.memory_space<vmem>>, vector<16x128xf32>
    %c0_2 = arith.constant 0 : index
    %c0_3 = arith.constant 0 : index
    %4 = vector.load %arg3[%c0_2, %c0_3] : memref<16x128xbf16, #tpu.memory_space<vmem>>, vector<16x128xbf16>
    %c0_4 = arith.constant 0 : index
    %c0_5 = arith.constant 0 : index
    %5 = vector.load %arg4[%c0_4, %c0_5] : memref<128x128xbf16, #tpu.memory_space<vmem>>, vector<128x128xbf16>
    %cst = arith.constant dense<0.000000e+00> : vector<16x128xf32>
    %6 = tpu.matmul %4, %5, %cst {dimension_numbers = #tpu.dot_dimension_numbers<[1], [0], [0], [1], [0, 0, 1, 1], [], []>} : vector<16x128xbf16>, vector<128x128xbf16>, vector<16x128xf32> -> vector<16x128xf32>
    %7 = arith.addf %3, %6 : vector<16x128xf32>
    %c0_6 = arith.constant 0 : index
    %c0_7 = arith.constant 0 : index
    %8 = vector.load %arg7[%c0_6, %c0_7] : memref<16x128xf32, #tpu.memory_space<vmem>>, vector<16x128xf32>
    tpu.vector_store %arg7[%c0_6, %c0_7], %7 {strides = array<i32>} : memref<16x128xf32, #tpu.memory_space<vmem>>, vector<16x128xf32>,
    %c0_i32_8 = arith.constant 0 : i32
    %9 = arith.cmpi eq, %arg2, %c0_i32_8 : i32
    %10 = arith.extui %9 : i1 to i32
    %c0_i32_9 = arith.constant 0 : i32
    %11 = arith.cmpi ne, %10, %c0_i32_9 : i32
    scf.if %11 {
      %c0_10 = arith.constant 0 : index
      %c0_11 = arith.constant 0 : index
      %12 = vector.load %arg7[%c0_10, %c0_11] : memref<16x128xf32, #tpu.memory_space<vmem>>, vector<16x128xf32>
      %c0_12 = arith.constant 0 : index
      %c0_13 = arith.constant 0 : index
      %13 = vector.load %arg5[%c0_12, %c0_13] : memref<1x128xf32, #tpu.memory_space<vmem>>, vector<1x128xf32>
      %14 = vector.broadcast %13 : vector<1x128xf32> to vector<16x128xf32>
      %15 = arith.addf %12, %14 : vector<16x128xf32>
      %cst_14 = arith.constant 0.000000e+00 : f32
      %16 = vector.broadcast %cst_14 : f32 to vector<16x128xf32>
      %17 = arith.maximumf %15, %16 : vector<16x128xf32>
      %c0_15 = arith.constant 0 : index
      %c0_16 = arith.constant 0 : index
      %18 = vector.load %arg6[%c0_15, %c0_16] : memref<16x128xf32, #tpu.memory_space<vmem>>, vector<16x128xf32>
      tpu.vector_store %arg6[%c0_15, %c0_16], %17 {strides = array<i32>} : memref<16x128xf32, #tpu.memory_space<vmem>>, vector<16x128xf32>,
    } else {
    }
    return
  }
  func.func @transform_0(%arg0: i32, %arg1: i32, %arg2: i32) -> (i32, i32) {
    %c0_i32 = arith.constant 0 : i32
    return %arg0, %arg2 : i32, i32
  }
  func.func @transform_1(%arg0: i32, %arg1: i32, %arg2: i32) -> (i32, i32) {
    %c0_i32 = arith.constant 0 : i32
    return %arg2, %arg1 : i32, i32
  }
  func.func @transform_2(%arg0: i32, %arg1: i32, %arg2: i32) -> (i32, i32) {
    %c0_i32 = arith.constant 0 : i32
    %c0_i32_0 = arith.constant 0 : i32
    return %c0_i32, %arg1 : i32, i32
  }
  func.func @transform_3(%arg0: i32, %arg1: i32, %arg2: i32) -> (i32, i32) {
    %c0_i32 = arith.constant 0 : i32
    return %arg0, %arg1 : i32, i32
  }
}

module attributes {stable_mosaic.version = 11 : i64} {
  func.func @_log_softmax_seq_kernel(%arg0: i32, %arg1: memref<1x8x16xf32, #tpu.memory_space<vmem>>, %arg2: memref<1x8x16xf32, #tpu.memory_space<vmem>>) attributes {dimension_semantics = [#tpu.dimension_semantics<parallel>], iteration_bounds = array<i64: 2>, scalar_prefetch = 0 : i64, scratch_operands = 0 : i64, tpu.core_type = #tpu.core_type<tc>, window_params = [{transform_indices = @transform_0, window_bounds = array<i64: 1, 8, 16>}, {transform_indices = @transform_1, window_bounds = array<i64: 1, 8, 16>}]} {
    %c0 = arith.constant 0 : index
    %c0_0 = arith.constant 0 : index
    %c0_1 = arith.constant 0 : index
    %0 = vector.load %arg1[%c0, %c0_0, %c0_1] : memref<1x8x16xf32, #tpu.memory_space<vmem>>, vector<1x8x16xf32>
    %1 = vector.shape_cast %0 : vector<1x8x16xf32> to vector<8x16xf32>
    %cst = arith.constant dense<0xFF800000> : vector<16xf32>
    %2 = vector.multi_reduction <maximumf>, %1, %cst [0] : vector<8x16xf32> to vector<16xf32>
    %3 = vector.shape_cast %2 : vector<16xf32> to vector<1x16xf32>
    %4 = vector.broadcast %3 : vector<1x16xf32> to vector<8x16xf32>
    %5 = arith.subf %1, %4 : vector<8x16xf32>
    %6 = math.exp %5 : vector<8x16xf32>
    %cst_2 = arith.constant dense<0.000000e+00> : vector<16xf32>
    %7 = vector.multi_reduction <add>, %6, %cst_2 [0] : vector<8x16xf32> to vector<16xf32>
    %8 = vector.shape_cast %7 : vector<16xf32> to vector<1x16xf32>
    %9 = math.log %8 : vector<1x16xf32>
    %10 = vector.broadcast %9 : vector<1x16xf32> to vector<8x16xf32>
    %11 = arith.subf %5, %10 : vector<8x16xf32>
    %c0_3 = arith.constant 0 : index
    %c0_4 = arith.constant 0 : index
    %c0_5 = arith.constant 0 : index
    %12 = vector.load %arg2[%c0_3, %c0_4, %c0_5] : memref<1x8x16xf32, #tpu.memory_space<vmem>>, vector<1x8x16xf32>
    %13 = vector.shape_cast %12 : vector<1x8x16xf32> to vector<8x16xf32>
    %14 = vector.shape_cast %11 : vector<8x16xf32> to vector<1x8x16xf32>
    tpu.vector_store %arg2[%c0_3, %c0_4, %c0_5], %14 {strides = array<i32>} : memref<1x8x16xf32, #tpu.memory_space<vmem>>, vector<1x8x16xf32>,
    return
  }
  func.func @transform_0(%arg0: i32) -> (i32, i32, i32) {
    %c0_i32 = arith.constant 0 : i32
    %c0_i32_0 = arith.constant 0 : i32
    %c0_i32_1 = arith.constant 0 : i32
    return %arg0, %c0_i32, %c0_i32_0 : i32, i32, i32
  }
  func.func @transform_1(%arg0: i32) -> (i32, i32, i32) {
    %c0_i32 = arith.constant 0 : i32
    %c0_i32_0 = arith.constant 0 : i32
    %c0_i32_1 = arith.constant 0 : i32
    return %arg0, %c0_i32, %c0_i32_0 : i32, i32, i32
  }
}

</mosaic_0001>

<bundles_post_ra>
// kernel: transformer_forward.54
= control target key start
LH: loop header
LB: loop body
LE: loop exit
PB: predicated region body
PF: predicated region fallthrough
CT: control target
= control target key end

     0   :  { %v210_v0 = vmov 0.0   ;;  %vm211_vm0 = vmmov 0   ;;  %s268_s1 = inlined_call_operand.vmem [shape: bf16[128,128], index: 1, kind: input, shape index: {}]   ;;  %s269_s0 = inlined_call_operand.vmem [shape: bf16[16,128], index: 0, kind: input, shape index: {}]   ;;  %s270_s2 = inlined_call_operand.vmem [shape: f32[1,128], index: 2, kind: input, shape index: {}]   ;;  %s271_s3 = inlined_call_operand.vmem [shape: f32[16,128], index: 3, kind: output, shape index: {}]  }
   0x1   :  { %179 = vmatprep.subr.bf16.mxu0 %v210_v0  ;;  %v201_v1 = vld [vmem:[%s268_s1 + $0x38] sm:$0xff]   ;;  %195 = vmatprep.mubr.msk.bf16.mxu0 %vm211_vm0, %v210_v0  ;;  %v202_v2 = vld [vmem:[%s268_s1 + $0x30] sm:$0xff]   ;;  %v203_v3 = vld [vmem:[%s268_s1 + $0x28] sm:$0xff]  }
   0x2   :  { %180 = vmatpush3.bf16.msra.mxu0 %v201_v1  ;;  %v204_v4 = vld [vmem:[%s268_s1 + $0x20] sm:$0xff]   ;;  %v205_v5 = vld [vmem:[%s268_s1 + $0x18] sm:$0xff]   ;;  %v206_v6 = vld [vmem:[%s268_s1 + $0x10] sm:$0xff]  }
   0x3   :  { %181 = vmatprep.subr.bf16.mxu0 %v210_v0  ;;  %v207_v7 = vld [vmem:[%s268_s1 + $0x8] sm:$0xff]   ;;  %v208_v8 = vld [vmem:[%s268_s1] sm:$0xff]  }
   0x4   :  { %v209_v9 = vld [vmem:[%s269_s0] sm:$0xff]  }
   0x5   :  { %v169_v10 = vld [vmem:[%s270_s2] ss:$0 sm:$0xff] }
   0x6   :  { %182 = vmatpush3.bf16.msra.mxu0 %v202_v2 }
   0x7   :  { %183 = vmatprep.subr.bf16.mxu0 %v210_v0 }
   0xa   :  { %184 = vmatpush3.bf16.msra.mxu0 %v203_v3 }
   0xb   :  { %185 = vmatprep.subr.bf16.mxu0 %v210_v0 }
   0xe   :  { %186 = vmatpush3.bf16.msra.mxu0 %v204_v4 }
   0xf   :  { %187 = vmatprep.subr.bf16.mxu0 %v210_v0 }
  0x12   :  { %188 = vmatpush3.bf16.msra.mxu0 %v205_v5 }
  0x13   :  { %189 = vmatprep.subr.bf16.mxu0 %v210_v0 }
  0x16   :  { %190 = vmatpush3.bf16.msra.mxu0 %v206_v6 }
  0x17   :  { %191 = vmatprep.subr.bf16.mxu0 %v210_v0 }
  0x1a   :  { %192 = vmatpush3.bf16.msra.mxu0 %v207_v7 }
  0x1b   :  { %193 = vmatprep.subr.bf16.mxu0 %v210_v0 }
  0x1e   :  { %194 = vmatpush3.bf16.msra.mxu0 %v208_v8 }
  0x21   :  { %196 = vmatmul.mubr.bf16.vlgmr.msra.gmra.mxu0 %v209_v9 }
  0xe1   :  { %v129_v11 = vpop.f32.mrf.mxu0 }
  0xe2   :  { %v152_v12 = vadd.f32 %v169_v10, %v129_v11 }
  0xe3   :  { %v197_v13 = vpop.f32.mrf.mxu0 }
  0xe4   :  { %154 = vst [vmem:[%s271_s3] sm:$0xff] %v152_v12 }
  0xe5   :  { %v132_v14 = vpop.f32.mrf.mxu0 }
  0xe6   :  { %v153_v15 = vadd.f32 %v169_v10, %v132_v14 }
  0xe7   :  { %v198_v16 = vpop.f32.mrf.mxu0 }
  0xe8   :  { %155 = vst [vmem:[%s271_s3 + $0x8] sm:$0xff] %v153_v15 }

// kernel: transformer_forward.55
= control target key start
LH: loop header
LB: loop body
LE: loop exit
PB: predicated region body
PF: predicated region fallthrough
CT: control target
= control target key end

     0   :  { %s946_s15 = smov 0   ;;  %s1034_s0 = inlined_call_operand.vmem [shape: bf16[2,4,8,8], index: 0, kind: input, shape index: {}]   ;;  %s1035_s1 = inlined_call_operand.vmem [shape: bf16[2,4,8,8], index: 1, kind: input, shape index: {}]   ;;  %s1036_s2 = inlined_call_operand.vmem [shape: bf16[2,4,8,8], index: 2, kind: input, shape index: {}]   ;;  %s1037_s3 = inlined_call_operand.vmem [shape: f32[2,1,8,8], index: 3, kind: input, shape index: {}]   ;;  %s1038_s4 = inlined_call_operand.vmem [shape: f32[2,4,8,8], index: 4, kind: output, shape index: {}]  }
   0x1 LB: > { %s793_s16 = sadd.s32 4294967295, %s917_s15   ;;  %p797_p0 = scmp.ge.s32.totalorder %s917_s15, 1  ;;  %s917_s15 = sphi %s946_s15, %s14_s15  }
   0x2   : > { %p191_p1 = scmp.lt.s32.totalorder %s917_s15, 3 }
   0x4   : > { %p192_p2 = pnand %p797_p0, %p191_p1 }
   0x5   : > { %p231_p3 = scmp.lt.s32.totalorder (!%p192_p2), %s793_s16, 1 }
   0x6   : > { %195 = sbr.rel (%p192_p2) target bundleno = 744 (0x2e8), region = 36 }
   0xb   : > { %v919_v0 = vmov 0.0   ;;  %s1040_s16 = smov (!%p231_p3, %s793_s16), 1  ;;  %vm920_vm0 = vmmov 0   ;;  %vm269_vm1 = vcmask 64512   ;;  %vm516_vm3 = vcmask 1043456  }
   0xc   : > { %837 = vmatprep.subr.bf16.mxu0 %v919_v0  ;;  %843 = vmatprep.subr.bf16.mxu1 %v919_v0  ;;  %s963_s17 = sshll.u32 %s1040_s16, 4  ;;  %s804_s24 = sshll.u32 %s1040_s16, 3 }
   0xd   : > { %839 = vmatprep.mubr.msk.bf16.mxu0 %vm920_vm0, %v919_v0  ;;  %845 = vmatprep.mubr.msk.bf16.mxu1 %vm920_vm0, %v919_v0  ;;  %s240_s20 = scalar_lea.vmem %s1035_s1, %s963_s17  ;;  %s235_s23 = scalar_lea.vmem %s1034_s0, %s963_s17 }
   0xe   : > { %v260_v1 = vld [vmem:[%s240_s20] sm:$0xf]  ;;  %v261_v2 = vld [vmem:[%s240_s20 + $0x4] sm:$0xf]  ;;  %v262_v5 = vld [vmem:[%s240_s20 + $0x8] sm:$0xf]  ;;  %s249_s27 = scalar_lea.vmem %s1037_s3, %s804_s24  ;;  %s245_s30 = scalar_lea.vmem %s1036_s2, %s963_s17 }
   0xf   : > { %v274_v3 = vsel %vm269_vm1, %v260_v1, 0  ;;  %v320_v4 = vsel %vm269_vm1, %v261_v2, 0  ;;  %v263_v6 = vld [vmem:[%s240_s20 + $0xc] sm:$0xf]  ;;  %v256_v7 = vld [vmem:[%s235_s23] sm:$0xf] }
  0x10   : > { %838 = vmatpush3.bf16.xpose.msra.mxu0 %v274_v3  ;;  %844 = vmatpush3.bf16.xpose.msra.mxu1 %v320_v4  ;;  %v257_v8 = vld [vmem:[%s235_s23 + $0x4] sm:$0xf]  ;;  %v366_v9 = vsel %vm269_vm1, %v262_v5, 0  ;;  %v412_v10 = vsel %vm269_vm1, %v263_v6, 0  ;;  %v258_v11 = vld [vmem:[%s235_s23 + $0x8] sm:$0xf] }
  0x11   : > { %849 = vmatprep.subr.bf16.mxu0 %v919_v0  ;;  %855 = vmatprep.subr.bf16.mxu1 %v919_v0  ;;  %v259_v12 = vld [vmem:[%s235_s23 + $0xc] sm:$0xf]  ;;  %v268_v13 = vld [vmem:[%s249_s27] sm:$0xff]  ;;  %v266_v3 = vld [vmem:[%s245_s30 + $0x8] sm:$0xf]  ;;  %s820_s5 = sshll.u32 %s1040_s16, 5 }
  0x12   : > { %vm458_vm2 = vcmp.gt.f32.partialorder %v268_v13, 0.0  ;;  %v264_v62 = vld [vmem:[%s245_s30] sm:$0xf]  ;;  %v265_v63 = vld [vmem:[%s245_s30 + $0x4] sm:$0xf]  ;;  %v610_v4 = vsel %vm516_vm3, %v266_v3, 0  ;;  %s254_s8 = scalar_lea.vmem %s1038_s4, %s820_s5 }
  0x13   : > { %v518_v1 = vsel %vm516_vm3, %v264_v62, 0  ;;  %v564_v2 = vsel %vm516_vm3, %v265_v63, 0  ;;  %v267_v5 = vld [vmem:[%s245_s30 + $0xc] sm:$0xf] }
  0x14   : > { %v656_v6 = vsel %vm516_vm3, %v267_v5, 0 }
  0x17   : > { %840 = vmatmul.mubr.msk.bf16.vlgmr.msra.gmra.mxu0 %vm269_vm1, %v256_v7  ;;  %846 = vmatmul.mubr.msk.bf16.vlgmr.msra.gmra.mxu1 %vm269_vm1, %v257_v8 }
  0x18   : > { %850 = vmatpush3.bf16.xpose.msra.mxu0 %v366_v9  ;;  %856 = vmatpush3.bf16.xpose.msra.mxu1 %v412_v10 }
  0x19   : > { %851 = vmatprep.mubr.msk.bf16.mxu0 %vm920_vm0, %v919_v0  ;;  %857 = vmatprep.mubr.msk.bf16.mxu1 %vm920_vm0, %v919_v0 }
  0x1a   : > { %861 = vmatprep.subr.bf16.mxu0 %v919_v0  ;;  %867 = vmatprep.subr.bf16.mxu1 %v919_v0 }
  0x1f   : > { %852 = vmatmul.mubr.msk.bf16.vlgmr.msra.gmra.mxu0 %vm269_vm1, %v258_v11  ;;  %858 = vmatmul.mubr.msk.bf16.vlgmr.msra.gmra.mxu1 %vm269_vm1, %v259_v12 }
  0x20   : > { %863 = vmatprep.mubr.msk.bf16.mxu0 %vm920_vm0, %v919_v0  ;;  %869 = vmatprep.mubr.msk.bf16.mxu1 %vm920_vm0, %v919_v0 }
  0x21   : > { %862 = vmatpush3.bf16.msra.mxu0 %v518_v1  ;;  %868 = vmatpush3.bf16.msra.mxu1 %v564_v2 }
  0x22   : > { %873 = vmatprep.subr.bf16.mxu0 %v919_v0  ;;  %879 = vmatprep.subr.bf16.mxu1 %v919_v0 }
  0xd7   : > { %v310_v14 = vpop.f32.mrf.mxu0  ;;  %v356_v15 = vpop.f32.mrf.mxu1 }
  0xd8   : > { %v454_v16 = vmul.f32 0.35355338, %v310_v14  ;;  %v455_v17 = vmul.f32 0.35355338, %v356_v15 }
  0xd9   : > { %v841_v18 = vpop.f32.mrf.mxu0  ;;  %v847_v19 = vpop.f32.mrf.mxu1 }
  0xda   : > { %v461_v20 = vsel %vm458_vm2, %v454_v16, -1e+30  ;;  %v462_v21 = vsel %vm458_vm2, %v455_v17, -1e+30 }
  0xdb   : > { %v313_v22 = vpop.f32.mrf.mxu0  ;;  %v359_v23 = vpop.f32.mrf.mxu1  ;;  %v465_v24 = vsel %vm269_vm1, %v461_v20, -inf  ;;  %v468_v27 = vsel %vm269_vm1, %v462_v21, -inf }
  0xdc   : > { %466 = vmax.xlane.f32.xlu0 %v465_v24 }
  0xdd   : > { %v842_v25 = vpop.f32.mrf.mxu0  ;;  %v848_v26 = vpop.f32.mrf.mxu1 }
  0xdf   : > { %v402_v28 = vpop.f32.mrf.mxu0  ;;  %v448_v29 = vpop.f32.mrf.mxu1 }
  0xe0   : > { %v456_v30 = vmul.f32 0.35355338, %v402_v28  ;;  %v457_v31 = vmul.f32 0.35355338, %v448_v29  ;;  %469 = vmax.xlane.f32.xlu0 %v468_v27 }
  0xe1   : > { %v853_v32 = vpop.f32.mrf.mxu0  ;;  %v859_v33 = vpop.f32.mrf.mxu1 }
  0xe2   : > { %v463_v34 = vsel %vm458_vm2, %v456_v30, -1e+30  ;;  %v464_v35 = vsel %vm458_vm2, %v457_v31, -1e+30 }
  0xe3   : > { %v405_v36 = vpop.f32.mrf.mxu0  ;;  %v451_v37 = vpop.f32.mrf.mxu1  ;;  %v471_v38 = vsel %vm269_vm1, %v463_v34, -inf  ;;  %v474_v41 = vsel %vm269_vm1, %v464_v35, -inf }
  0xe4   : > { %472 = vmax.xlane.f32.xlu1 %v471_v38 }
  0xe5   : > { %v854_v39 = vpop.f32.mrf.mxu0  ;;  %v860_v40 = vpop.f32.mrf.mxu1 }
  0xe8   : > { %475 = vmax.xlane.f32.xlu1 %v474_v41 }
 0x165   : > { %v467_v42 = vpop.xlane.xlu0 %466 }
 0x166   : > { %v477_v43 = vsub.f32 %v461_v20, %v467_v42 }
 0x168   : > { %v481_v44 = vmul.f32 1.442695, %v477_v43 }
 0x169   : > { %v470_v45 = vpop.xlane.xlu0 %469 }
 0x16a   : > { %895 = vpow2.f32 %v481_v44  ;;  %v478_v46 = vsub.f32 %v462_v21, %v470_v45 }
 0x16c   : > { %v483_v47 = vmul.f32 1.442695, %v478_v46 }
 0x16d   : > { %v473_v48 = vpop.xlane.xlu1 %472 }
 0x16e   : > { %897 = vpow2.f32 %v483_v47  ;;  %v479_v49 = vsub.f32 %v463_v34, %v473_v48 }
 0x170   : > { %v485_v50 = vmul.f32 1.442695, %v479_v49 }
 0x171   : > { %v476_v51 = vpop.xlane.xlu1 %475 }
 0x172   : > { %899 = vpow2.f32 %v485_v50  ;;  %v480_v52 = vsub.f32 %v464_v35, %v476_v51 }
 0x174   : > { %v487_v53 = vmul.f32 1.442695, %v480_v52 }
 0x176   : > { %901 = vpow2.f32 %v487_v53 }
 0x177   : > { %v896_v54 = vpop.eup %895 }
 0x178   : > { %v489_v55 = vsel %vm269_vm1, %v896_v54, 0.0 }
 0x179   : > { %490 = vadd.xlane.f32.xlu0 %v489_v55 }
 0x17b   : > { %v898_v56 = vpop.eup %897 }
 0x17c   : > { %v492_v57 = vsel %vm269_vm1, %v898_v56, 0.0 }
 0x17d   : > { %493 = vadd.xlane.f32.xlu1 %v492_v57 }
 0x17f   : > { %v900_v58 = vpop.eup %899 }
 0x180   : > { %v495_v59 = vsel %vm269_vm1, %v900_v58, 0.0 }
 0x181   : > { %496 = vadd.xlane.f32.xlu0 %v495_v59 }
 0x183   : > { %v902_v60 = vpop.eup %901 }
 0x184   : > { %v498_v61 = vsel %vm269_vm1, %v902_v60, 0.0 }
 0x185   : > { %499 = vadd.xlane.f32.xlu1 %v498_v61 }
 0x202   : > { %v491_v7 = vpop.xlane.xlu0 %490 }
 0x203   : > { %903 = vrcp.f32 %v491_v7 }
 0x206   : > { %v494_v8 = vpop.xlane.xlu1 %493 }
 0x207   : > { %905 = vrcp.f32 %v494_v8 }
 0x20a   : > { %v497_v9 = vpop.xlane.xlu0 %496 }
 0x20b   : > { %907 = vrcp.f32 %v497_v9 }
 0x20e   : > { %v500_v10 = vpop.xlane.xlu1 %499 }
 0x20f   : > { %909 = vrcp.f32 %v500_v10 }
 0x210   : > { %v904_v11 = vpop.eup %903 }
 0x211   : > { %v505_v12 = vmul.f32 %v904_v11, %v896_v54 }
 0x213   : > { %v509_v13 = vpack.c.bf16 %v505_v12, %v505_v12 }
 0x214   : > { %v906_v14 = vpop.eup %905 }
 0x215   : > { %864 = vmatmul.mubr.msk.bf16.vlgmr.msra.gmra.mxu0 %vm269_vm1, %v509_v13  ;;  %v506_v15 = vmul.f32 %v906_v14, %v898_v56 }
 0x216   : > { %874 = vmatpush3.bf16.msra.mxu0 %v610_v4  ;;  %875 = vmatprep.mubr.msk.bf16.mxu0 %vm920_vm0, %v919_v0 }
 0x217   : > { %v510_v16 = vpack.c.bf16 %v506_v15, %v506_v15 }
 0x218   : > { %v908_v17 = vpop.eup %907 }
 0x219   : > { %870 = vmatmul.mubr.msk.bf16.vlgmr.msra.gmra.mxu1 %vm269_vm1, %v510_v16  ;;  %v507_v18 = vmul.f32 %v908_v17, %v900_v58 }
 0x21a   : > { %880 = vmatpush3.bf16.msra.mxu1 %v656_v6  ;;  %881 = vmatprep.mubr.msk.bf16.mxu1 %vm920_vm0, %v919_v0 }
 0x21b   : > { %v511_v19 = vpack.c.bf16 %v507_v18, %v507_v18 }
 0x21c   : > { %v910_v20 = vpop.eup %909 }
 0x21d   : > { %876 = vmatmul.mubr.msk.bf16.vlgmr.msra.gmra.mxu0 %vm269_vm1, %v511_v19  ;;  %v508_v21 = vmul.f32 %v910_v20, %v902_v60 }
 0x21f   : > { %v512_v22 = vpack.c.bf16 %v508_v21, %v508_v21 }
 0x221   : > { %882 = vmatmul.mubr.msk.bf16.vlgmr.msra.gmra.mxu1 %vm269_vm1, %v512_v22 }
 0x2d5   : > { %v554_v23 = vpop.f32.mrf.mxu0 }
 0x2d6   : > { %698 = vst.msk [vmem:[%s254_s8] sm:$0xff] %vm269_vm1, %v554_v23 }
 0x2d7   : > { %v865_v24 = vpop.f32.mrf.mxu0 }
 0x2d9   : > { %v557_v25 = vpop.f32.mrf.mxu0  ;;  %v600_v26 = vpop.f32.mrf.mxu1 }
 0x2da   : > { %699 = vst.msk [vmem:[%s254_s8 + $0x8] sm:$0xff] %vm269_vm1, %v600_v26 }
 0x2db   : > { %v866_v0 = vpop.f32.mrf.mxu0  ;;  %v871_v27 = vpop.f32.mrf.mxu1 }
 0x2dd   : > { %v603_v28 = vpop.f32.mrf.mxu1  ;;  %v646_v29 = vpop.f32.mrf.mxu0 }
 0x2de   : > { %700 = vst.msk [vmem:[%s254_s8 + $0x10] sm:$0xff] %vm269_vm1, %v646_v29 }
 0x2df   : > { %v872_v30 = vpop.f32.mrf.mxu1  ;;  %v877_v31 = vpop.f32.mrf.mxu0 }
 0x2e1   : > { %v649_v32 = vpop.f32.mrf.mxu0  ;;  %v692_v33 = vpop.f32.mrf.mxu1 }
 0x2e2   : > { %701 = vst.msk [vmem:[%s254_s8 + $0x18] sm:$0xff] %vm269_vm1, %v692_v33 }
 0x2e3   : > { %v878_v34 = vpop.f32.mrf.mxu0  ;;  %v883_v35 = vpop.f32.mrf.mxu1 }
 0x2e5   : > { %v695_v36 = vpop.f32.mrf.mxu1 }
 0x2e7   : > { %v884_v37 = vpop.f32.mrf.mxu1 }
 0x2e8 PF: > { %s14_s15 = sadd.s32 1, %s917_s15  }
 0x2e9   : > { %p11_p4 = scmp.ge.s32.totalorder %s14_s15, 4  }
 0x2eb   :  { %13 = sbr.rel (!%p11_p4) target bundleno = 1 (0x1), region = 75 }

// kernel: transformer_forward.57
= control target key start
LH: loop header
LB: loop body
LE: loop exit
PB: predicated region body
PF: predicated region fallthrough
CT: control target
= control target key end

     0   :  { %vm23_vm0 = vcmask 261120   ;;  %s136_s0 = inlined_call_operand.vmem [shape: f32[16,32], index: 0, kind: input, shape index: {}]   ;;  %s137_s1 = inlined_call_operand.vmem [shape: f32[16,32], index: 1, kind: input, shape index: {}]   ;;  %s138_s2 = inlined_call_operand.vmem [shape: f32[1,32], index: 2, kind: input, shape index: {}]   ;;  %s139_s3 = inlined_call_operand.vmem [shape: f32[1,32], index: 3, kind: input, shape index: {}]   ;;  %s140_s4 = inlined_call_operand.vmem [shape: f32[16,32], index: 4, kind: output, shape index: {}]  }
   0x1   :  { %v17_v0 = vld [vmem:[%s136_s0] sm:$0xff]  ;;  %v18_v2 = vld [vmem:[%s136_s0 + $0x8] sm:$0xff] }
   0x2   :  { %v19_v1 = vld [vmem:[%s137_s1] sm:$0xff]  ;;  %v20_v4 = vld [vmem:[%s137_s1 + $0x8] sm:$0xff] }
   0x3   :  { %v21_v3 = vadd.f32 %v19_v1, %v17_v0  ;;  %v22_v5 = vadd.f32 %v20_v4, %v18_v2  ;;  %v75_v25 = vld [vmem:[%s138_s2] ss:$0 sm:$0xff] }
   0x4   :  { %v76_v27 = vld [vmem:[%s139_s3] ss:$0 sm:$0xff] }
   0x5   :  { %v24_v6 = vsel %vm23_vm0, %v21_v3, 0.0  ;;  %v27_v7 = vsel %vm23_vm0, %v22_v5, 0.0 }
   0x6   :  { %25 = vadd.xlane.f32.xlu0 %v24_v6 }
   0xa   :  { %28 = vadd.xlane.f32.xlu0 %v27_v7 }
  0x8f   :  { %v26_v8 = vpop.xlane.xlu0 %25 }
  0x90   :  { %v31_v9 = vmul.f32 0.03125, %v26_v8 }
  0x92   :  { %v33_v10 = vsub.f32 %v21_v3, %v31_v9 }
  0x93   :  { %v29_v11 = vpop.xlane.xlu0 %28 }
  0x94   :  { %v32_v12 = vmul.f32 0.03125, %v29_v11  ;;  %v35_v13 = vmul.f32 %v33_v10, %v33_v10 }
  0x96   :  { %v34_v14 = vsub.f32 %v22_v5, %v32_v12  ;;  %v37_v15 = vsel %vm23_vm0, %v35_v13, 0.0 }
  0x97   :  { %38 = vadd.xlane.f32.xlu1 %v37_v15 }
  0x98   :  { %v36_v16 = vmul.f32 %v34_v14, %v34_v14 }
  0x9a   :  { %v40_v17 = vsel %vm23_vm0, %v36_v16, 0.0 }
  0x9b   :  { %41 = vadd.xlane.f32.xlu1 %v40_v17 }
 0x120   :  { %v39_v18 = vpop.xlane.xlu1 %38 }
 0x121   :  { %v43_v19 = vmul.f32 0.03125, %v39_v18 }
 0x123   :  { %v45_v20 = vadd.f32 1e-05, %v43_v19 }
 0x124   :  { %v42_v21 = vpop.xlane.xlu1 %41 }
 0x125   :  { %77 = vrsqrt.f32 %v45_v20  ;;  %v44_v22 = vmul.f32 0.03125, %v42_v21 }
 0x127   :  { %v46_v23 = vadd.f32 1e-05, %v44_v22 }
 0x129   :  { %79 = vrsqrt.f32 %v46_v23 }
 0x132   :  { %v78_v24 = vpop.eup %77 }
 0x133   :  { %v49_v26 = vmul.f32 %v78_v24, %v33_v10 }
 0x135   :  { %v58_v28 = vmul.f32 %v75_v25, %v49_v26 }
 0x136   :  { %v80_v29 = vpop.eup %79 }
 0x137   :  { %v67_v30 = vadd.f32 %v76_v27, %v58_v28  ;;  %v50_v31 = vmul.f32 %v80_v29, %v34_v14 }
 0x139   :  { %69 = vst.msk [vmem:[%s140_s4] sm:$0xff] %vm23_vm0, %v67_v30  ;;  %v59_v32 = vmul.f32 %v75_v25, %v50_v31 }
 0x13b   :  { %v68_v33 = vadd.f32 %v76_v27, %v59_v32 }
 0x13d   :  { %70 = vst.msk [vmem:[%s140_s4 + $0x8] sm:$0xff] %vm23_vm0, %v68_v33 }

// kernel: transformer_forward.44
= control target key start
LH: loop header
LB: loop body
LE: loop exit
PB: predicated region body
PF: predicated region fallthrough
CT: control target
= control target key end

     0   :  { %v212_v0 = vmov 0.0   ;;  %vm213_vm0 = vmmov 0   ;;  %s270_s1 = inlined_call_operand.vmem [shape: bf16[128,128], index: 1, kind: input, shape index: {}]   ;;  %s271_s0 = inlined_call_operand.vmem [shape: bf16[16,128], index: 0, kind: input, shape index: {}]   ;;  %s272_s2 = inlined_call_operand.vmem [shape: f32[1,128], index: 2, kind: input, shape index: {}]   ;;  %s273_s3 = inlined_call_operand.vmem [shape: f32[16,128], index: 3, kind: output, shape index: {}]  }
   0x1   :  { %181 = vmatprep.subr.bf16.mxu0 %v212_v0  ;;  %v203_v1 = vld [vmem:[%s270_s1 + $0x38] sm:$0xff]   ;;  %197 = vmatprep.mubr.msk.bf16.mxu0 %vm213_vm0, %v212_v0  ;;  %v204_v2 = vld [vmem:[%s270_s1 + $0x30] sm:$0xff]   ;;  %v205_v3 = vld [vmem:[%s270_s1 + $0x28] sm:$0xff]  }
   0x2   :  { %182 = vmatpush3.bf16.msra.mxu0 %v203_v1  ;;  %v206_v4 = vld [vmem:[%s270_s1 + $0x20] sm:$0xff]   ;;  %v207_v5 = vld [vmem:[%s270_s1 + $0x18] sm:$0xff]   ;;  %v208_v6 = vld [vmem:[%s270_s1 + $0x10] sm:$0xff]  }
   0x3   :  { %183 = vmatprep.subr.bf16.mxu0 %v212_v0  ;;  %v209_v7 = vld [vmem:[%s270_s1 + $0x8] sm:$0xff]   ;;  %v210_v8 = vld [vmem:[%s270_s1] sm:$0xff]  }
   0x4   :  { %v211_v9 = vld [vmem:[%s271_s0] sm:$0xff]  }
   0x5   :  { %v171_v10 = vld [vmem:[%s272_s2] ss:$0 sm:$0xff] }
   0x6   :  { %184 = vmatpush3.bf16.msra.mxu0 %v204_v2 }
   0x7   :  { %185 = vmatprep.subr.bf16.mxu0 %v212_v0 }
   0xa   :  { %186 = vmatpush3.bf16.msra.mxu0 %v205_v3 }
   0xb   :  { %187 = vmatprep.subr.bf16.mxu0 %v212_v0 }
   0xe   :  { %188 = vmatpush3.bf16.msra.mxu0 %v206_v4 }
   0xf   :  { %189 = vmatprep.subr.bf16.mxu0 %v212_v0 }
  0x12   :  { %190 = vmatpush3.bf16.msra.mxu0 %v207_v5 }
  0x13   :  { %191 = vmatprep.subr.bf16.mxu0 %v212_v0 }
  0x16   :  { %192 = vmatpush3.bf16.msra.mxu0 %v208_v6 }
  0x17   :  { %193 = vmatprep.subr.bf16.mxu0 %v212_v0 }
  0x1a   :  { %194 = vmatpush3.bf16.msra.mxu0 %v209_v7 }
  0x1b   :  { %195 = vmatprep.subr.bf16.mxu0 %v212_v0 }
  0x1e   :  { %196 = vmatpush3.bf16.msra.mxu0 %v210_v8 }
  0x21   :  { %198 = vmatmul.mubr.bf16.vlgmr.msra.gmra.mxu0 %v211_v9 }
  0xe1   :  { %v129_v11 = vpop.f32.mrf.mxu0 }
  0xe2   :  { %v152_v12 = vadd.f32 %v171_v10, %v129_v11 }
  0xe3   :  { %v199_v13 = vpop.f32.mrf.mxu0 }
  0xe4   :  { %v154_v14 = vmax.f32 %v152_v12, 0.0 }
  0xe5   :  { %v132_v15 = vpop.f32.mrf.mxu0 }
  0xe6   :  { %156 = vst [vmem:[%s273_s3] sm:$0xff] %v154_v14  ;;  %v153_v16 = vadd.f32 %v171_v10, %v132_v15 }
  0xe7   :  { %v200_v17 = vpop.f32.mrf.mxu0 }
  0xe8   :  { %v155_v18 = vmax.f32 %v153_v16, 0.0 }
  0xea   :  { %157 = vst [vmem:[%s273_s3 + $0x8] sm:$0xff] %v155_v18 }

// kernel: transformer_forward.79
= control target key start
LH: loop header
LB: loop body
LE: loop exit
PB: predicated region body
PF: predicated region fallthrough
CT: control target
= control target key end

     0   :  { %6 = vsyncpa [#allocation3], 0  ;;  %s424_s0 = inlined_call_operand.vmem [shape: f32[2,8,16], index: 0, kind: input, shape index: {}]   ;;  %s425_s1 = inlined_call_operand.hbm [shape: f32[2,8,16], index: 1, kind: output, shape index: {}]  }
   0x1   :  { %8 = vsyncpa [#allocation3 + $0x1], 0  ;;  %s334_s6 = smov 0   ;;  %s336_s7 = smov 0  }
   0x2   :  { %s338_s8 = smov 0   ;;  %s340_s9 = smov 0  }
   0x3 LB: > { %s355_s10 = sadd.s32 4294967295, %s321_s9   ;;  %s208_s11 = sadd.s32 4294967294, %s321_s9   ;;  %s321_s9 = sphi %s340_s9, %s431_s9   ;;  %s317_s8 = sphi %s338_s8, %s430_s8   ;;  %s313_s7 = sphi %s336_s7, %s429_s7   ;;  %s309_s6 = sphi %s334_s6, %s428_s6  }
   0x4   : > { %s359_s12 = sadd.s32 1, %s321_s9   ;;  %s47_s13 = sadd.s32 1, %s317_s8 }
   0x5   : > { %s44_s14 = ssub.s32 %s321_s9, %s359_s12  ;;  %p57_p0 = scmp.ne.s32.totalorder %s317_s8, %s313_s7 }
   0x6   : > { %p45_p1 = scmp.eq.s32.totalorder %s44_s14, 0  ;;  %p58_p2 = scmp.eq.s32.totalorder %s355_s10, 1 }
   0x7   : > { %p63_p3 = scmp.ne.s32.totalorder %s313_s7, %s309_s6  ;;  %p64_p4 = scmp.eq.s32.totalorder %s208_s11, 1 }
   0x8   : > { %s370_s15 = scalar_select %p45_p1, %s317_s8, %s47_s13  }
   0x9   : > { %p372_p5 = por %p58_p2, %p57_p0  ;;  %p376_p6 = por %p64_p4, %p63_p3 }
   0xa   : > { %p211_p7 = scmp.ge.s32.totalorder %s321_s9, 1  ;;  %p89_p8 = scmp.lt.s32.totalorder %s321_s9, 3 }
   0xc   : > { %p90_p9 = pnand %p211_p7, %p89_p8 }
   0xd   : > { %p108_p10 = scmp.lt.s32.totalorder (!%p90_p9), %s355_s10, 1  ;;  %s105_s23 = sand.u32 (!%p90_p9), 1, %s313_s7  }
   0xe   : > { %93 = sbr.rel (%p90_p9) target bundleno = 99 (0x63), region = 24  ;;  %s212_s24 = sshll.u32 (!%p90_p9), %s105_s23, 3 }
   0xf   : > { %s107_s25 = scalar_lea.vmem (!%p90_p9), [#allocation2], %s212_s24  ;;  %s215_s27 = sshll.u32 (!%p90_p9), %s355_s10, 7 }
  0x10   : > { %s149_s26 = sshll.u32 (!%p90_p9), %s107_s25, 4  ;;  %s147_s30 = scalar_lea.hbm (!%p90_p9), %s425_s1, %s215_s27  ;;  %s150_s26 = int_to_ptr.vmem [resolvable:$true] %s149_s26 }
  0x11   : > { %s136_s2 = scalar_lea.sflag (!%p90_p9), [#allocation3], %s105_s23  ;;  %s261_s3 = scalar_lea.vmem (!%p90_p9), %s150_s26, 128 }
  0x12   : > { %p262_p11 = scmp.ne.s32.totalorder (!%p90_p9), %s150_s26, %s261_s3  ;;  %s323_s4 = smov (!%p90_p9), [#allocation2]  }
  0x13   : > { %s109_s18 = scalar_select %p108_p10, %s355_s10, 1  ;;  %vm113_vm0 = vcmask 130048  }
  0x14   : > { %p263_p12 = pnand %p262_p11, %p372_p5  ;;  %s265_s5 = sshll.u32 %s323_s4, 4  ;;  %s266_s5 = int_to_ptr.vmem [resolvable:$false] %s265_s5 }
  0x15   : > { %s213_s19 = sshll.u32 %s109_s18, 3  ;;  %s267_s11 = scalar_lea.vmem %s266_s5, 256 }
  0x16   : > { %s111_s22 = scalar_lea.vmem %s424_s0, %s213_s19  ;;  %p264_p13 = pneg %p263_p12 }
  0x17   : > { %v112_v0 = vld [vmem:[%s111_s22] sm:$0xff]  ;;  %p268_p0 = scmp.lt.s32.totalorder %s150_s26, %s266_s5  ;;  %p269_p1 = scmp.lt.s32.totalorder %s267_s11, %s261_s3 }
  0x18   : > { %v114_v1 = vsel %vm113_vm0, %v112_v0, -inf }
  0x19   : > { %v115_v2 = vrot.slane %v114_v1, 4  ;;  %p270_p2 = por %p269_p1, %p268_p0 }
  0x1b   : > { %v116_v3 = vmax.f32 %v114_v1, %v115_v2  ;;  %p271_p3 = pnand %p270_p2, %p264_p13 }
  0x1d   : > { %v117_v4 = vrot.slane %v116_v3, 2 }
  0x1f   : > { %v118_v5 = vmax.f32 %v116_v3, %v117_v4 }
  0x21   : > { %v119_v6 = vrot.slane %v118_v5, 1 }
  0x23   : > { %v120_v7 = vmax.f32 %v118_v5, %v119_v6 }
  0x25   : > { %v121_v8 = vsub.f32 %v112_v0, %v120_v7 }
  0x27   : > { %v122_v9 = vmul.f32 1.442695, %v121_v8 }
  0x29   : > { %257 = vpow2.f32 %v122_v9 }
  0x36   : > { %v258_v10 = vpop.eup %257 }
  0x37   : > { %v124_v11 = vsel %vm113_vm0, %v258_v10, 0.0 }
  0x38   : > { %v125_v12 = vrot.slane %v124_v11, 4 }
  0x3a   : > { %v126_v13 = vadd.f32 %v125_v12, %v124_v11 }
  0x3c   : > { %v127_v14 = vrot.slane %v126_v13, 2 }
  0x3e   : > { %v128_v15 = vadd.f32 %v127_v14, %v126_v13 }
  0x40   : > { %v129_v16 = vrot.slane %v128_v15, 1 }
  0x42   : > { %v130_v17 = vadd.f32 %v129_v16, %v128_v15 }
  0x44   : > { %259 = vlog2.f32 %v130_v17 }
  0x51   : > { %v260_v18 = vpop.eup %259 }
  0x52   : > { %v132_v19 = vmul.f32 0.6931472, %v260_v18 }
  0x54   : > { %v133_v20 = vsub.f32 %v121_v8, %v132_v19 }
  0x56   : > { %134 = vst.msk [vmem:[%s107_s25] sm:$0xff] %vm113_vm0, %v133_v20 }
  0x57   : > { %274 = shalt.err (!%p271_p3)
}
  0x58   : > { %s275_s10 = scalar_lea.hbm %s147_s30, 128  ;;  %s279_s18 = scalar_lea.hbm %s425_s1, 256 }
  0x59   : > { %p276_p4 = scmp.ne.s32.totalorder %s147_s30, %s275_s10  ;;  %p280_p9 = scmp.lt.s32.totalorder %s147_s30, %s425_s1 }
  0x5a   : > { %p281_p10 = scmp.lt.s32.totalorder %s279_s18, %s275_s10 }
  0x5b   : > { %p277_p7 = pnand %p276_p4, %p372_p5 }
  0x5c   : > { %p282_p11 = por %p281_p10, %p280_p9 }
  0x5d   : > { %p278_p8 = pneg %p277_p7 }
  0x5f   : > { %p283_p12 = pnand %p282_p11, %p278_p8 }
  0x61   : > { %286 = shalt.err (!%p283_p12)
}
  0x62   : > { %218 = dma.vmem_to_hbm [thread:$0]  (%p372_p5), %s150_s26, 128, %s147_s30, %s136_s2  }
  0x63 PF: > { %p224_p13 = scmp.ge.s32.totalorder %s321_s9, 2  ;;  %s161_s21 = sand.u32 1, %s309_s6  }
  0x64   : > { %s162_s22 = scalar_lea.sflag [#allocation3], %s161_s21 }
  0x65   : > { %p221_p0 = pnand %p224_p13, %p376_p6 }
  0x67   : > { %p222_p1 = pneg %p221_p0 }
  0x69   : > { %304 = dma.done.wait (%p222_p1), %s162_s22, 128  }
  0x6a   : > { %306 = vsyncadd (%p222_p1), %s162_s22, 4294967168  ;;  %p11_p2 = scmp.ge.s32.totalorder %s359_s12, 4   ;;  %s428_s6 = smov %s313_s7 }
  0x6b   : > { %s429_s7 = smov %s317_s8  ;;  %s430_s8 = smov %s370_s15 }
  0x6c   : > { %s431_s9 = smov %s359_s12  ;;  %13 = sbr.rel (!%p11_p2) target bundleno = 3 (0x3), region = 59 }
  0x71   :  { %167 = vsyncpa [#allocation3], 1 }
  0x72   :  { %169 = vsyncpa [#allocation3 + $0x1], 1 }

</bundles_post_ra>
